<compile_context>
chip_gen: v5e
topology: v5e:2x2
jax: 0.10.0
libtpu: 0.0.40
codegen_flags: <defaults>
</compile_context>

<pallas_src>
import functools

import jax
import jax.numpy as jnp
from jax.experimental import pallas as pl
from jax.experimental.pallas import tpu as pltpu


_VMEM_LIMIT = 48 * 1024 * 1024      # generous, still < v7x's 64 MiB physical VMEM
_RESIDENT_BYTES = 6 * 1024 * 1024   # weights below this stay fully VMEM-resident


def _round_up(x, m):
    return (x + m - 1) // m * m


# ----------------------------------------------------------------------------
# Fused matmul (bias + optional residual + ReLU epilogue, f32 accumulator)
# ----------------------------------------------------------------------------
def _matmul_kernel(*refs, relu, has_res):
    if has_res:
        a_ref, b_ref, bias_ref, res_ref, o_ref, acc_ref = refs
    else:
        a_ref, b_ref, bias_ref, o_ref, acc_ref = refs
        res_ref = None

    k = pl.program_id(2)

    @pl.when(k == 0)
    def _():
        acc_ref[...] = jnp.zeros_like(acc_ref)

    acc_ref[...] += jnp.dot(a_ref[...], b_ref[...],
                            preferred_element_type=jnp.float32)

    @pl.when(k == pl.num_programs(2) - 1)
    def _():
        out = acc_ref[...] + bias_ref[...]
        if has_res:
            out = out + res_ref[...].astype(jnp.float32)
        if relu:
            out = jnp.maximum(out, 0.0)
        o_ref[...] = out.astype(o_ref.dtype)


def _choose_tk(kp):
    for t in (512, 256, 128):
        if kp % t == 0:
            return t
    return kp


def _pick_tm(mp8, cap=512):
    """Largest M tile (<=cap) that divides M -> no whole-array M-pad copies."""
    if mp8 <= cap:
        return mp8, mp8
    for t in range(cap, 127, -8):
        if mp8 % t == 0:
            return t, mp8
    return 256, _round_up(mp8, 256)   # rare fallback: pad M


@functools.partial(jax.jit, static_argnames=("relu", "out_dtype"))
def fused_matmul(a, b, bias, residual=None, *, relu=False, out_dtype=jnp.bfloat16):
    """out = act(a @ b + bias [+ residual]) on the MXU.

    `b` is pre-packed (K, Np) (Np a multiple of 128).  Whenever `b` fits in VMEM
    (every weight in this network) it is made fully resident (TK=Kp, TN=Np), so
    A, B and the output each stream through HBM exactly once.
    """
    M, K = a.shape
    Kp, Np = b.shape
    assert K <= Kp

    mp8 = _round_up(M, 8)
    TM, Mp = _pick_tm(mp8)
    if Mp != M or K != Kp:
        a = jnp.pad(a, ((0, Mp - M), (0, Kp - K)))              # single merged pad
        if residual is not None and Mp != M:
            residual = jnp.pad(residual, ((0, Mp - M), (0, 0)))

    n_m = Mp // TM
    if Kp * Np * b.dtype.itemsize <= _RESIDENT_BYTES or Kp % 128 != 0:
        TK, TN = Kp, Np
        if n_m == 1 and Np % 256 == 0:    # keep >=2 parallel blocks (v7x megacore)
            TN = Np // 2
    else:
        TK = _choose_tk(Kp)
        TN = 512 if Np % 512 == 0 else (256 if Np % 256 == 0 else 128)

    has_res = residual is not None
    in_specs = [
        pl.BlockSpec((TM, TK), lambda i, j, k: (i, k)),
        pl.BlockSpec((TK, TN), lambda i, j, k: (k, j)),
        pl.BlockSpec((1, TN), lambda i, j, k: (0, j)),
    ]
    inputs = [a, b, bias]
    if has_res:
        in_specs.append(pl.BlockSpec((TM, TN), lambda i, j, k: (i, j)))
        inputs.append(residual)

    grid = (n_m, Np // TN, Kp // TK)
    out = pl.pallas_call(
        functools.partial(_matmul_kernel, relu=relu, has_res=has_res),
        out_shape=jax.ShapeDtypeStruct((Mp, Np), out_dtype),
        grid_spec=pltpu.PrefetchScalarGridSpec(
            num_scalar_prefetch=0,
            grid=grid,
            in_specs=in_specs,
            out_specs=pl.BlockSpec((TM, TN), lambda i, j, k: (i, j)),
            scratch_shapes=[pltpu.VMEM((TM, TN), jnp.float32)],
        ),
        compiler_params=pltpu.CompilerParams(
            dimension_semantics=("parallel", "parallel", "arbitrary"),
            vmem_limit_bytes=_VMEM_LIMIT),
    )(*inputs)
    if Mp != M:
        out = out[:M]
    return out


# ----------------------------------------------------------------------------
# Implicit-GEMM 3x3 stride-1 conv (padding == dilation), no materialized im2col
# ----------------------------------------------------------------------------
def _conv3x3_kernel(x_hbm, w_ref, b_ref, o_ref, hs_ref, sem_ref, *,
                    TH, W, Wp, Hp, d, C, R, M1, tiles_per_img, relu):
    t = pl.program_id(0)
    nt = pl.num_programs(0)

    def halo_copy(tile, slot):
        n = tile // tiles_per_img
        r0 = (tile % tiles_per_img) * TH
        start = n * (Hp * Wp) + r0 * Wp           # flat row offset in padded input
        return pltpu.make_async_copy(x_hbm.at[pl.ds(start, R), :],
                                     hs_ref.at[slot], sem_ref.at[slot])

    @pl.when(t == 0)
    def _():
        halo_copy(t, 0).start()                   # prime the pipeline

    slot = t % 2
    halo_copy(t, slot).wait()

    @pl.when(t + 1 < nt)
    def _():
        halo_copy(t + 1, 1 - slot).start()        # prefetch next tile's halo

    np_ = w_ref.shape[1]
    acc = jnp.zeros((M1, np_), jnp.float32)
    for kk in range(9):                           # 9 kernel taps = 9 shifted slabs
        ki, kj = kk // 3, kk % 3
        off = (ki * Wp + kj) * d
        a_kk = hs_ref[slot, pl.ds(off, M1), :]
        acc = acc + jnp.dot(a_kk, w_ref[kk * C:(kk + 1) * C, :],
                            preferred_element_type=jnp.float32)

    out = acc + b_ref[...]
    if relu:
        out = jnp.maximum(out, 0.0)
    out = out.astype(o_ref.dtype)
    for h in range(TH):                           # drop the 2d junk columns per row
        o_ref[0, h * W:(h + 1) * W, :] = out[h * Wp:h * Wp + W, :]


def _pick_conv_th(H, Wp, C, Np, d, budget=12 * 2**20):
    best = 1
    for th in range(1, min(H, 64) + 1):
        if H % th:
            continue
        halo = 2 * ((th + 2 * d) * Wp + 2 * d) * C * 2
        acc = th * Wp * Np * 4
        slab = 2 * th * Wp * C * 2
        outb = 2 * th * Wp * Np * 2
        if halo + acc + slab + outb <= budget:
            best = th
    return best


@functools.partial(jax.jit, static_argnames=("dilation", "relu", "out_dtype"))
def conv3x3_s1_nhwc(x, w_packed, bias_p, *, dilation=1, relu=True,
                    out_dtype=jnp.bfloat16):
    """3x3 conv, stride 1, padding == dilation, as an implicit-GEMM kernel."""
    N, H, W, C = x.shape
    d = dilation
    Kp, Np = w_packed.shape
    assert Kp == 9 * C
    Wp = W + 2 * d
    Hp = H + 2 * d + 1        # +1 junk row keeps the last tile's flat reads in-image
    xp = jnp.pad(x, ((0, 0), (d, d + 1), (d, d), (0, 0)))
    xflat = xp.reshape(N * Hp * Wp, C)

    TH = _pick_conv_th(H, Wp, C, Np, d)
    tiles_per_img = H // TH
    n_tiles = N * tiles_per_img
    M1 = TH * Wp                          # rows per tile incl. junk columns
    R = (TH + 2 * d) * Wp + 2 * d         # halo rows fetched per tile

    kernel = functools.partial(_conv3x3_kernel, TH=TH, W=W, Wp=Wp, Hp=Hp, d=d,
                               C=C, R=R, M1=M1, tiles_per_img=tiles_per_img,
                               relu=relu)
    out = pl.pallas_call(
        kernel,
        out_shape=jax.ShapeDtypeStruct((n_tiles, TH * W, Np), out_dtype),
        grid_spec=pltpu.PrefetchScalarGridSpec(
            num_scalar_prefetch=0,
            grid=(n_tiles,),
            in_specs=[
                pl.BlockSpec(memory_space=pl.ANY),            # activation stays in HBM
                pl.BlockSpec((Kp, Np), lambda t: (0, 0)),     # resident weight
                pl.BlockSpec((1, Np), lambda t: (0, 0)),      # resident bias
            ],
            out_specs=pl.BlockSpec((1, TH * W, Np), lambda t: (t, 0, 0)),
            scratch_shapes=[
                pltpu.VMEM((2, R, C), x.dtype),               # double-buffered halo
                pltpu.SemaphoreType.DMA((2,)),
            ],
        ),
        compiler_params=pltpu.CompilerParams(
            dimension_semantics=("arbitrary",),               # sequential: x-step prefetch
            vmem_limit_bytes=_VMEM_LIMIT),
    )(xflat, w_packed, bias_p)
    return out.reshape(N, H, W, Np)


# ----------------------------------------------------------------------------
# MaxPool 3x3 / stride 2 / pad 1 — single streaming pass
# ----------------------------------------------------------------------------
def _pool_kernel(main_ref, extra_ref, o_ref, *, TH, Wo, C):
    v = main_ref[0]            # (2*TH, Wo+1, 2*C): W pairs packed into lanes
    ve = extra_ref[0]          # (1,    Wo+1, 2*C): the one overlapping boundary row

    def wpool(u):              # 3-tap / stride-2 max along W via the pair packing
        even = u[:, :, :C]                       # xp[2w']
        odd = u[:, :Wo, C:]                      # xp[2w'+1]
        return jnp.maximum(jnp.maximum(even[:, :Wo, :], odd), even[:, 1:Wo + 1, :])

    wm = wpool(v)                                # (2*TH, Wo, C)
    wm_e = wpool(ve)                             # (1, Wo, C)
    wr = wm.reshape(TH, 2, Wo, C)                # split rows into (pair, parity)
    r0 = wr[:, 0]                                # padded rows 2r
    r1 = wr[:, 1]                                # padded rows 2r+1
    r2 = jnp.concatenate([wr[1:, 0], wm_e], axis=0)   # padded rows 2r+2
    o_ref[0] = jnp.maximum(jnp.maximum(r0, r1), r2)


def _pick_pool_th(Ho, P, C2, budget=8 * 2**20):
    best = 1
    for th in range(1, Ho + 1):
        if Ho % th:
            continue
        blk = 2 * (2 * th) * P * C2 * 2
        out = 2 * th * (P - 1) * (C2 // 2) * 2
        if blk + out <= budget:
            best = th
    return best


@jax.jit
def maxpool_3x3_s2_p1_nhwc(x):
    """MaxPool2d(kernel=3, stride=2, padding=1) on NHWC, one streaming read."""
    N, H, W, C = x.shape
    Ho = (H - 1) // 2 + 1
    Wo = (W - 1) // 2 + 1
    neg = jnp.finfo(x.dtype).min                 # dtype-safe "-inf" pad value
    hp = 2 * Ho + 1
    wp = 2 * Wo + 2                              # even width so pairs pack into lanes
    xp = jnp.pad(x, ((0, 0), (1, hp - 1 - H), (1, wp - 1 - W), (0, 0)),
                 constant_values=neg)
    P = wp // 2
    xpair = xp.reshape(N, hp, P, 2 * C)          # free reshape: (even, odd) -> lanes

    TH = _pick_pool_th(Ho, P, 2 * C)
    kern = functools.partial(_pool_kernel, TH=TH, Wo=Wo, C=C)
    return pl.pallas_call(
        kern,
        out_shape=jax.ShapeDtypeStruct((N, Ho, Wo, C), x.dtype),
        grid_spec=pltpu.PrefetchScalarGridSpec(
            num_scalar_prefetch=0,
            grid=(N, Ho // TH),
            in_specs=[
                pl.BlockSpec((1, 2 * TH, P, 2 * C), lambda n, t: (n, t, 0, 0)),
                pl.BlockSpec((1, 1, P, 2 * C),
                             lambda n, t: (n, 2 * TH * (t + 1), 0, 0)),
            ],
            out_specs=pl.BlockSpec((1, TH, Wo, C), lambda n, t: (n, t, 0, 0)),
        ),
        compiler_params=pltpu.CompilerParams(
            dimension_semantics=("parallel", "parallel"),
            vmem_limit_bytes=_VMEM_LIMIT),
    )(xpair, xpair)


# ----------------------------------------------------------------------------
# 1x1 conv and im2col fallback (7x7 stem, single stride-2 3x3)
# ----------------------------------------------------------------------------
@functools.partial(jax.jit, static_argnames=("relu", "out_dtype"))
def conv1x1(x, w_packed, bias_p, residual=None, *, relu=False,
            out_dtype=jnp.bfloat16):
    N, H, W, C = x.shape
    Kp, Np = w_packed.shape
    assert C == Kp
    a = x.reshape(N * H * W, C)
    res = None if residual is None else residual.reshape(N * H * W, Np)
    out = fused_matmul(a, w_packed, bias_p, res, relu=relu, out_dtype=out_dtype)
    return out.reshape(N, H, W, Np)


@functools.partial(jax.jit, static_argnames=("kh", "kw", "stride", "padding",
                                             "dilation", "relu", "out_dtype"))
def conv2d_im2col(x, w_packed, bias_p, *, kh, kw, stride=1, padding=0,
                  dilation=1, relu=False, out_dtype=jnp.bfloat16):
    # TODO(synk): only the 7x7 stem and the single stride-2 3x3 conv use this
    # XLA-materialized im2col path.
    N, H, W, C = x.shape
    Kp, Np = w_packed.shape
    assert Kp == kh * kw * C
    Ho = (H + 2 * padding - dilation * (kh - 1) - 1) // stride + 1
    Wo = (W + 2 * padding - dilation * (kw - 1) - 1) // stride + 1
    xp = jnp.pad(x, ((0, 0), (padding, padding), (padding, padding), (0, 0)))
    chunks = []
    for i in range(kh):
        for j in range(kw):
            hi, wi = i * dilation, j * dilation
            chunks.append(xp[:, hi:hi + (Ho - 1) * stride + 1:stride,
                             wi:wi + (Wo - 1) * stride + 1:stride, :])
    a = jnp.concatenate(chunks, axis=-1).reshape(N * Ho * Wo, Kp)
    out = fused_matmul(a, w_packed, bias_p, relu=relu, out_dtype=out_dtype)
    return out.reshape(N, Ho, Wo, Np)


# ----------------------------------------------------------------------------
# Bilinear upsample (align_corners=True, as nn.functional.upsample_bilinear)
# ----------------------------------------------------------------------------
def _interp_matrix(out_size, in_size):
    if in_size == 1:
        return jnp.ones((out_size, 1), jnp.float32)
    if out_size == 1:
        return jnp.zeros((1, in_size), jnp.float32).at[0, 0].set(1.0)
    src = jnp.arange(out_size, dtype=jnp.float32) * (in_size - 1) / (out_size - 1)
    i0 = jnp.clip(jnp.floor(src).astype(jnp.int32), 0, in_size - 1)
    i1 = jnp.clip(i0 + 1, 0, in_size - 1)
    frac = src - i0.astype(jnp.float32)
    rows = jnp.arange(out_size)
    a = jnp.zeros((out_size, in_size), jnp.float32)
    a = a.at[rows, i0].add(1.0 - frac)
    a = a.at[rows, i1].add(frac)
    return a


def _pad2d(x, rows, cols):
    r, c = x.shape
    if r == rows and c == cols:
        return x
    return jnp.pad(x, ((0, rows - r), (0, cols - c)))


@functools.partial(jax.jit, static_argnames=("out_h", "out_w"))
def upsample_bilinear_nhwc_to_nchw(x, out_h, out_w):
    """Height pass first, then width pass -> lands in NCHW with no final transpose."""
    N, h, w, C = x.shape
    ay = _interp_matrix(out_h, h)
    ax = _interp_matrix(out_w, w)

    # Height pass: rows (N, w, C), reduce over h.
    nh = _round_up(out_h, 128)
    bh = _pad2d(ay.T, h, nh)
    t = jnp.transpose(x, (0, 2, 3, 1)).reshape(N * w * C, h)
    t = fused_matmul(t, bh, jnp.zeros((1, nh), jnp.float32),
                     relu=False, out_dtype=jnp.float32)
    t = t[:, :out_h].reshape(N, w, C, out_h)

    # Width pass: rows (N, C, Ho), reduce over w; output is already NCHW.
    nw = _round_up(out_w, 128)
    bw = _pad2d(ax.T, w, nw)
    t = jnp.transpose(t, (0, 2, 3, 1)).reshape(N * C * out_h, w)
    t = fused_matmul(t, bw, jnp.zeros((1, nw), jnp.float32),
                     relu=False, out_dtype=jnp.float32)
    return t[:, :out_w].reshape(N, C, out_h, out_w)


# ----------------------------------------------------------------------------
# Parameters (deterministic synthetic init; BN folded; pre-packed bf16 weights)
# ----------------------------------------------------------------------------
def _fold_bn(w, gamma, beta, mean, var, eps=1e-5):
    scale = gamma / jnp.sqrt(var + eps)
    return w * scale[:, None, None, None], beta - mean * scale


def _conv_bn_params(key, cout, cin, ksize):
    kw_, kg, kb, km, kv = jax.random.split(key, 5)
    fan_in = cin * ksize * ksize
    w = jax.random.normal(kw_, (cout, cin, ksize, ksize), jnp.float32) * jnp.sqrt(2.0 / fan_in)
    gamma = 1.0 + 0.05 * jax.random.normal(kg, (cout,), jnp.float32)
    beta = 0.05 * jax.random.normal(kb, (cout,), jnp.float32)
    mean = 0.05 * jax.random.normal(km, (cout,), jnp.float32)
    var = 1.0 + 0.05 * jax.random.uniform(kv, (cout,), jnp.float32)
    return _fold_bn(w, gamma, beta, mean, var)


def _pack_conv(w, bias, cin_stored):
    """Pack (Cout, Cin, kh, kw) + bias into a lane-dense (K, Np) bf16 matrix
    (K ordered as kh, kw, cin_stored; no K padding) and a (1, Np) f32 bias."""
    cout, cin, kh, kw = w.shape
    np_ = _round_up(cout, 128)
    k = kh * kw * cin_stored
    wt = jnp.zeros((kh, kw, cin_stored, np_), jnp.float32)
    wt = wt.at[:, :, :cin, :cout].set(jnp.transpose(w, (2, 3, 1, 0)))
    wp = wt.reshape(k, np_)
    bp = jnp.zeros((1, np_), jnp.float32).at[0, :cout].set(bias)
    return wp.astype(jnp.bfloat16), bp


# (planes, num_blocks, first_block_stride, dilation) for output_stride=8.
LAYER_SPECS = [
    (64, 3, 1, 1),
    (128, 4, 2, 1),
    (256, 6, 1, 2),
    (512, 3, 1, 4),
]


def init_resnet50_8s_params(key, num_classes):
    counter = [0]

    def nk():
        counter[0] += 1
        return jax.random.fold_in(key, counter[0])

    w, b = _conv_bn_params(nk(), 64, 3, 7)
    params = {"conv1": _pack_conv(w, b, cin_stored=3)}
    inplanes = 64
    layers = []
    for planes, blocks, stride, dilation in LAYER_SPECS:
        blks = []
        for bi in range(blocks):
            in_stored = _round_up(inplanes, 128)
            mid_stored = _round_up(planes, 128)
            blk = {
                "conv1": _pack_conv(*_conv_bn_params(nk(), planes, inplanes, 1),
                                    cin_stored=in_stored),
                "conv2": _pack_conv(*_conv_bn_params(nk(), planes, planes, 3),
                                    cin_stored=mid_stored),
                "conv3": _pack_conv(*_conv_bn_params(nk(), planes * 4, planes, 1),
                                    cin_stored=mid_stored),
                "stride": stride if bi == 0 else 1,
                "dilation": dilation,
            }
            if bi == 0:  # downsample branch (1x1 conv + BN)
                blk["down"] = _pack_conv(*_conv_bn_params(nk(), planes * 4, inplanes, 1),
                                         cin_stored=in_stored)
            blks.append(blk)
            inplanes = planes * 4
        layers.append(blks)
    params["layers"] = layers
    # fc replaced by 1x1 conv, _normal_initialization: weight ~ N(0, 0.01), bias = 0
    w_fc = 0.01 * jax.random.normal(nk(), (num_classes, inplanes, 1, 1), jnp.float32)
    b_fc = jnp.zeros((num_classes,), jnp.float32)
    params["fc"] = _pack_conv(w_fc, b_fc, cin_stored=_round_up(inplanes, 128))
    return params


# ----------------------------------------------------------------------------
# Forward pass
# ----------------------------------------------------------------------------
def _bottleneck(x, blk):
    s, d = blk["stride"], blk["dilation"]
    w1, b1 = blk["conv1"]
    out = conv1x1(x, w1, b1, relu=True)
    w2, b2 = blk["conv2"]
    if s == 1:
        out = conv3x3_s1_nhwc(out, w2, b2, dilation=d, relu=True)
    else:
        out = conv2d_im2col(out, w2, b2, kh=3, kw=3, stride=s, padding=d,
                            dilation=d, relu=True)
    if "down" in blk:
        wd, bd = blk["down"]
        xin = x[:, ::s, ::s, :] if s != 1 else x
        residual = conv1x1(xin, wd, bd, relu=False)
    else:
        residual = x
    # conv3 with residual add + ReLU fused into the matmul epilogue
    w3, b3 = blk["conv3"]
    return conv1x1(out, w3, b3, residual, relu=True)


def resnet50_8s_forward(params, x, num_classes):
    in_h, in_w = x.shape[2], x.shape[3]
    h = jnp.transpose(x, (0, 2, 3, 1)).astype(jnp.bfloat16)   # NCHW -> NHWC bf16 once
    w, b = params["conv1"]
    h = conv2d_im2col(h, w, b, kh=7, kw=7, stride=2, padding=3, dilation=1, relu=True)
    h = maxpool_3x3_s2_p1_nhwc(h)
    for blks in params["layers"]:
        for blk in blks:
            h = _bottleneck(h, blk)
    w_fc, b_fc = params["fc"]
    h = conv1x1(h, w_fc, b_fc, relu=False, out_dtype=jnp.float32)
    h = h[..., :num_classes]                                   # drop channel padding
    return upsample_bilinear_nhwc_to_nchw(h, in_h, in_w)       # NCHW f32


if __name__ == "__main__":
    key = jax.random.PRNGKey(0)
    num_classes = 16  # constructor argument of Resnet50_8s (default 1000)
    params = init_resnet50_8s_params(key, num_classes)
    x = jax.random.normal(jax.random.fold_in(key, 12345), (2, 3, 16, 16), jnp.float32)
    y = resnet50_8s_forward(params, x, num_classes)
    y = jax.block_until_ready(y)
    assert y.shape == (2, num_classes, 16, 16), y.shape
    assert bool(jnp.all(jnp.isfinite(y)))
    print("KERNEL_OK")
</pallas_src>

<mosaic_0001>
module attributes {stable_mosaic.version = 11 : i64} {
  func.func @_matmul_kernel(%arg0: i32, %arg1: i32, %arg2: i32, %arg3: memref<128x147xbf16, #tpu.memory_space<vmem>>, %arg4: memref<147x128xbf16, #tpu.memory_space<vmem>>, %arg5: memref<1x128xf32, #tpu.memory_space<vmem>>, %arg6: memref<128x128xbf16, #tpu.memory_space<vmem>>, %arg7: memref<128x128xf32, #tpu.memory_space<vmem>>) attributes {dimension_semantics = [#tpu.dimension_semantics<parallel>, #tpu.dimension_semantics<parallel>, #tpu.dimension_semantics<arbitrary>], iteration_bounds = array<i64: 1, 1, 1>, scalar_prefetch = 0 : i64, scratch_operands = 1 : i64, tpu.core_type = #tpu.core_type<tc>, window_params = [{transform_indices = @transform_0, window_bounds = array<i64: 128, 147>}, {transform_indices = @transform_1, window_bounds = array<i64: 147, 128>}, {transform_indices = @transform_2, window_bounds = array<i64: 1, 128>}, {transform_indices = @transform_3, window_bounds = array<i64: 128, 128>}]} {
    %c0_i32 = arith.constant 0 : i32
    %0 = arith.cmpi eq, %arg2, %c0_i32 : i32
    %1 = arith.extui %0 : i1 to i32
    %c0_i32_0 = arith.constant 0 : i32
    %2 = arith.cmpi ne, %1, %c0_i32_0 : i32
    scf.if %2 {
      %cst_10 = arith.constant 0.000000e+00 : f32
      %12 = vector.broadcast %cst_10 : f32 to vector<128x128xf32>
      %c0_11 = arith.constant 0 : index
      %c0_12 = arith.constant 0 : index
      %13 = vector.load %arg7[%c0_11, %c0_12] : memref<128x128xf32, #tpu.memory_space<vmem>>, vector<128x128xf32>
      tpu.vector_store %arg7[%c0_11, %c0_12], %12 {strides = array<i32>} : memref<128x128xf32, #tpu.memory_space<vmem>>, vector<128x128xf32>,
    } else {
    }
    %c0 = arith.constant 0 : index
    %c0_1 = arith.constant 0 : index
    %3 = vector.load %arg7[%c0, %c0_1] : memref<128x128xf32, #tpu.memory_space<vmem>>, vector<128x128xf32>
    %c0_2 = arith.constant 0 : index
    %c0_3 = arith.constant 0 : index
    %4 = vector.load %arg3[%c0_2, %c0_3] : memref<128x147xbf16, #tpu.memory_space<vmem>>, vector<128x147xbf16>
    %c0_4 = arith.constant 0 : index
    %c0_5 = arith.constant 0 : index
    %5 = vector.load %arg4[%c0_4, %c0_5] : memref<147x128xbf16, #tpu.memory_space<vmem>>, vector<147x128xbf16>
    %cst = arith.constant dense<0.000000e+00> : vector<128x128xf32>
    %6 = tpu.matmul %4, %5, %cst {dimension_numbers = #tpu.dot_dimension_numbers<[1], [0], [0], [1], [0, 0, 1, 1], [], []>} : vector<128x147xbf16>, vector<147x128xbf16>, vector<128x128xf32> -> vector<128x128xf32>
    %7 = arith.addf %3, %6 : vector<128x128xf32>
    %c0_6 = arith.constant 0 : index
    %c0_7 = arith.constant 0 : index
    %8 = vector.load %arg7[%c0_6, %c0_7] : memref<128x128xf32, #tpu.memory_space<vmem>>, vector<128x128xf32>
    tpu.vector_store %arg7[%c0_6, %c0_7], %7 {strides = array<i32>} : memref<128x128xf32, #tpu.memory_space<vmem>>, vector<128x128xf32>,
    %c0_i32_8 = arith.constant 0 : i32
    %9 = arith.cmpi eq, %arg2, %c0_i32_8 : i32
    %10 = arith.extui %9 : i1 to i32
    %c0_i32_9 = arith.constant 0 : i32
    %11 = arith.cmpi ne, %10, %c0_i32_9 : i32
    scf.if %11 {
      %c0_10 = arith.constant 0 : index
      %c0_11 = arith.constant 0 : index
      %12 = vector.load %arg7[%c0_10, %c0_11] : memref<128x128xf32, #tpu.memory_space<vmem>>, vector<128x128xf32>
      %c0_12 = arith.constant 0 : index
      %c0_13 = arith.constant 0 : index
      %13 = vector.load %arg5[%c0_12, %c0_13] : memref<1x128xf32, #tpu.memory_space<vmem>>, vector<1x128xf32>
      %14 = vector.broadcast %13 : vector<1x128xf32> to vector<128x128xf32>
      %15 = arith.addf %12, %14 : vector<128x128xf32>
      %cst_14 = arith.constant 0.000000e+00 : f32
      %16 = vector.broadcast %cst_14 : f32 to vector<128x128xf32>
      %17 = arith.maximumf %15, %16 : vector<128x128xf32>
      %18 = arith.truncf %17 : vector<128x128xf32> to vector<128x128xbf16>
      %c0_15 = arith.constant 0 : index
      %c0_16 = arith.constant 0 : index
      %19 = vector.load %arg6[%c0_15, %c0_16] : memref<128x128xbf16, #tpu.memory_space<vmem>>, vector<128x128xbf16>
      tpu.vector_store %arg6[%c0_15, %c0_16], %18 {strides = array<i32>} : memref<128x128xbf16, #tpu.memory_space<vmem>>, vector<128x128xbf16>,
    } else {
    }
    return
  }
  func.func @transform_0(%arg0: i32, %arg1: i32, %arg2: i32) -> (i32, i32) {
    %c0_i32 = arith.constant 0 : i32
    return %arg0, %arg2 : i32, i32
  }
  func.func @transform_1(%arg0: i32, %arg1: i32, %arg2: i32) -> (i32, i32) {
    %c0_i32 = arith.constant 0 : i32
    return %arg2, %arg1 : i32, i32
  }
  func.func @transform_2(%arg0: i32, %arg1: i32, %arg2: i32) -> (i32, i32) {
    %c0_i32 = arith.constant 0 : i32
    %c0_i32_0 = arith.constant 0 : i32
    return %c0_i32, %arg1 : i32, i32
  }
  func.func @transform_3(%arg0: i32, %arg1: i32, %arg2: i32) -> (i32, i32) {
    %c0_i32 = arith.constant 0 : i32
    return %arg0, %arg1 : i32, i32
  }
}

</mosaic_0001>

<bundles_post_ra>
// kernel: fused_matmul.1
= control target key start
LH: loop header
LB: loop body
LE: loop exit
PB: predicated region body
PF: predicated region fallthrough
CT: control target
= control target key end

     0   :  { %vm241_vm0 = vcmask 1040384   ;;  %vm242_vm1 = vcmask 1041408   ;;  %v704_v4 = vmov 65535   ;;  %s886_s0 = inlined_call_operand.vmem [shape: bf16[128,147], index: 0, kind: input, shape index: {}]   ;;  %s887_s1 = inlined_call_operand.vmem [shape: bf16[147,128], index: 1, kind: input, shape index: {}]   ;;  %s888_s2 = inlined_call_operand.vmem [shape: f32[1,128], index: 2, kind: input, shape index: {}]   ;;  %s889_s3 = inlined_call_operand.hbm [shape: bf16[128,128], index: 3, kind: output, shape index: {}]  }
   0x1   :  { %v614_v0 = vld [vmem:[%s887_s1 + $0x38] sm:$0xff]  ;;  %v86_v1 = vld [vmem:[%s887_s1 + $0x48] sm:$0x3]  ;;  %v613_v3 = vld [vmem:[%s887_s1 + $0x30] sm:$0xff]  ;;  %v243_v5 = vsel %vm241_vm0, 4294967295, %v704_v4 }
   0x2   :  { %v196_v2 = vunpack.c.l.b16 %v86_v1  ;;  %248 = vmatpush.bf16.msra.mxu0 %v614_v0  ;;  %663 = vmatpush.bf16.msra.mxu2 %v614_v0  ;;  %v244_v7 = vsel %vm242_vm1, %v243_v5, 0  ;;  %v612_v9 = vld [vmem:[%s887_s1 + $0x28] sm:$0xff]  ;;  %v615_v10 = vld [vmem:[%s887_s1 + $0x40] sm:$0xff] }
   0x3   :  { %v591_v11 = vld [vmem:[%s886_s0 + $0x4] sm:$0xf]  ;;  %v487_v12 = vld [vmem:[%s886_s0 + $0x8] sm:$0xf0] }
   0x4   :  { %v206_v6 = vpack.c.b16 %v196_v2, %v196_v2 }
   0x6   :  { %v246_v8 = vand.u32 %v244_v7, %v206_v6  ;;  %249 = vmatpush.bf16.msra.mxu0 %v613_v3  ;;  %664 = vmatpush.bf16.msra.mxu2 %v613_v3 }
   0x8   :  { %303 = vmatpush.bf16.msra.mxu1 %v246_v8  ;;  %671 = vmatpush.bf16.msra.mxu3 %v246_v8 }
   0x9   :  { %8 = vsyncpa [#allocation4], 0  ;;  %v601_v13 = vld [vmem:[%s886_s0 + $0x54] sm:$0xf]  ;;  %v527_v14 = vld [vmem:[%s886_s0 + $0x58] sm:$0xf0]  ;;  %v490_v15 = vor.u32 %v591_v11, %v487_v12 }
   0xa   :  { %250 = vmatpush.bf16.msra.mxu0 %v612_v9  ;;  %665 = vmatpush.bf16.msra.mxu2 %v612_v9  ;;  %v611_v16 = vld [vmem:[%s887_s1 + $0x20] sm:$0xff]  ;;  %vm216_vm2 = vcmask 154624   ;;  %v530_v17 = vor.u32 %v601_v13, %v527_v14  ;;  %v610_v18 = vld [vmem:[%s887_s1 + $0x18] sm:$0xff]  ;;  %v609_v19 = vld [vmem:[%s887_s1 + $0x10] sm:$0xff]  ;;  %s471_s17 = sshll.u32 %s889_s3, 4  ;;  %s706_s18 = smov 64   ;;  %s472_s17 = int_to_ptr.hbm [resolvable:$true] %s471_s17 }
   0xb   :  { %v608_v20 = vld [vmem:[%s887_s1 + $0x8] sm:$0xff]  ;;  %v593_v21 = vld [vmem:[%s886_s0 + $0x14] sm:$0xf]  ;;  %v495_v22 = vld [vmem:[%s886_s0 + $0x18] sm:$0xf0]  ;;  %s707_s19 = smov 4  }
   0xc   :  { %304 = vmatpush.bf16.msra.mxu1 %v615_v10  ;;  %672 = vmatpush.bf16.msra.mxu3 %v615_v10  ;;  %v603_v23 = vld [vmem:[%s886_s0 + $0x64] sm:$0xf]  ;;  %v535_v24 = vld [vmem:[%s886_s0 + $0x68] sm:$0xf0]  ;;  %v498_v25 = vor.u32 %v593_v21, %v495_v22  ;;  %v485_v27 = vld [vmem:[%s886_s0] sm:$0xf] }
   0xd   :  { %v607_v26 = vld [vmem:[%s887_s1] sm:$0xff]  ;;  %v592_v28 = vld [vmem:[%s886_s0 + $0x4] sm:$0xf0]  ;;  %v538_v31 = vor.u32 %v603_v23, %v535_v24  ;;  %v503_v35 = vld [vmem:[%s886_s0 + $0x28] sm:$0xf0] }
   0xe   :  { %251 = vmatpush.bf16.msra.mxu0 %v611_v16  ;;  %666 = vmatpush.bf16.msra.mxu2 %v611_v16  ;;  %v517_v29 = vld [vmem:[%s886_s0 + $0x40] sm:$0xf]  ;;  %v600_v30 = vld [vmem:[%s886_s0 + $0x44] sm:$0xf0]  ;;  %v486_v32 = vor.u32 %v592_v28, %v485_v27  ;;  %v595_v34 = vld [vmem:[%s886_s0 + $0x24] sm:$0xf] }
   0xf   :  { %583 = vmatmul.msk.bf16.vlgmr.msra.gmra.mxu1 %vm216_vm2, %v490_v15  ;;  %588 = vmatmul.msk.bf16.vlgmr.msra.gmra.mxu3 %vm216_vm2, %v530_v17  ;;  %v518_v33 = vor.u32 %v600_v30, %v517_v29  ;;  %v605_v36 = vld [vmem:[%s886_s0 + $0x74] sm:$0xf]  ;;  %v543_v37 = vld [vmem:[%s886_s0 + $0x78] sm:$0xf0]  ;;  %v506_v38 = vor.u32 %v595_v34, %v503_v35  ;;  %v493_v39 = vld [vmem:[%s886_s0 + $0x10] sm:$0xf] }
  0x10   :  { %v594_v40 = vld [vmem:[%s886_s0 + $0x14] sm:$0xf0]  ;;  %v525_v41 = vld [vmem:[%s886_s0 + $0x50] sm:$0xf]  ;;  %v546_v43 = vor.u32 %v605_v36, %v543_v37  ;;  %v597_v46 = vld [vmem:[%s886_s0 + $0x34] sm:$0xf] }
  0x11   :  { %v602_v42 = vld [vmem:[%s886_s0 + $0x54] sm:$0xf0]  ;;  %v494_v44 = vor.u32 %v594_v40, %v493_v39  ;;  %v511_v47 = vld [vmem:[%s886_s0 + $0x38] sm:$0xf0]  ;;  %v501_v49 = vld [vmem:[%s886_s0 + $0x20] sm:$0xf] }
  0x12   :  { %252 = vmatpush.bf16.msra.mxu0 %v610_v18  ;;  %667 = vmatpush.bf16.msra.mxu2 %v610_v18  ;;  %v526_v45 = vor.u32 %v602_v42, %v525_v41  ;;  %v514_v48 = vor.u32 %v597_v46, %v511_v47  ;;  %v596_v50 = vld [vmem:[%s886_s0 + $0x24] sm:$0xf0]  ;;  %v533_v51 = vld [vmem:[%s886_s0 + $0x60] sm:$0xf]  ;;  %v599_v55 = vld [vmem:[%s886_s0 + $0x44] sm:$0xf] }
  0x13   :  { %v604_v52 = vld [vmem:[%s886_s0 + $0x64] sm:$0xf0]  ;;  %v502_v53 = vor.u32 %v596_v50, %v501_v49  ;;  %v519_v56 = vld [vmem:[%s886_s0 + $0x48] sm:$0xf0]  ;;  %v509_v58 = vld [vmem:[%s886_s0 + $0x30] sm:$0xf] }
  0x14   :  { %v534_v54 = vor.u32 %v604_v52, %v533_v51  ;;  %v522_v57 = vor.u32 %v599_v55, %v519_v56  ;;  %v598_v59 = vld [vmem:[%s886_s0 + $0x34] sm:$0xf0]  ;;  %v541_v60 = vld [vmem:[%s886_s0 + $0x70] sm:$0xf]  ;;  %v865_v5 = vld [vmem:[%s888_s2] ss:$0 sm:$0xff] }
  0x15   :  { %v606_v61 = vld [vmem:[%s886_s0 + $0x74] sm:$0xf0]  ;;  %v510_v62 = vor.u32 %v598_v59, %v509_v58  ;;  %s705_s0 = smov [#allocation3]  }
  0x16   :  { %253 = vmatpush.bf16.msra.mxu0 %v609_v19  ;;  %668 = vmatpush.bf16.msra.mxu2 %v609_v19  ;;  %v542_v63 = vor.u32 %v606_v61, %v541_v60  ;;  %s469_s2 = sshll.u32 %s705_s0, 4  ;;  %s470_s2 = int_to_ptr.vmem [resolvable:$true] %s469_s2 }
  0x1a   :  { %254 = vmatpush.bf16.msra.mxu0 %v608_v20  ;;  %669 = vmatpush.bf16.msra.mxu2 %v608_v20 }
  0x1e   :  { %255 = vmatpush.bf16.msra.mxu0 %v607_v26  ;;  %670 = vmatpush.bf16.msra.mxu2 %v607_v26 }
  0x1f   :  { %584 = vmatmul.msk.bf16.gmra.mxu1 %vm216_vm2, %v498_v25  ;;  %589 = vmatmul.msk.bf16.gmra.mxu3 %vm216_vm2, %v538_v31 }
  0x21   :  { %256 = vmatmul.bf16.vlgmr.msra.gmra.mxu0 %v486_v32  ;;  %276 = vmatmul.bf16.vlgmr.msra.gmra.mxu2 %v518_v33 }
  0x2f   :  { %585 = vmatmul.msk.bf16.gmra.mxu1 %vm216_vm2, %v506_v38  ;;  %590 = vmatmul.msk.bf16.gmra.mxu3 %vm216_vm2, %v546_v43 }
  0x31   :  { %261 = vmatmul.bf16.gmra.mxu0 %v494_v44  ;;  %281 = vmatmul.bf16.gmra.mxu2 %v526_v45 }
  0x3f   :  { %586 = vmatmul.msk.bf16.gmra.mxu1 %vm216_vm2, %v514_v48 }
  0x41   :  { %266 = vmatmul.bf16.gmra.mxu0 %v502_v53  ;;  %286 = vmatmul.bf16.gmra.mxu2 %v534_v54 }
  0x4f   :  { %587 = vmatmul.msk.bf16.gmra.mxu1 %vm216_vm2, %v522_v57 }
  0x51   :  { %271 = vmatmul.bf16.gmra.mxu0 %v510_v62  ;;  %291 = vmatmul.bf16.gmra.mxu2 %v542_v63 }
  0x8c   :  { %v306_v0 = vpop.f32.mrf.mxu1 }
  0x92   :  { %v331_v15 = vpop.f32.mrf.mxu3 }
  0x94   :  { %v308_v1 = vpop.f32.mrf.mxu1 }
  0x9a   :  { %v333_v22 = vpop.f32.mrf.mxu3 }
  0x9c   :  { %v311_v2 = vpop.f32.mrf.mxu1 }
  0x9e   :  { %v257_v3 = vpop.f32.mrf.mxu0 }
  0x9f   :  { %v307_v4 = vadd.f32 %v306_v0, %v257_v3 }
  0xa1   :  { %v401_v9 = vadd.f32 %v865_v5, %v307_v4 }
  0xa2   :  { %v336_v36 = vpop.f32.mrf.mxu3 }
  0xa3   :  { %v417_v12 = vmax.f32 %v401_v9, 0.0 }
  0xa4   :  { %v313_v6 = vpop.f32.mrf.mxu1  ;;  %v277_v7 = vpop.f32.mrf.mxu2 }
  0xa6   :  { %v259_v8 = vpop.f32.mrf.mxu0 }
  0xa7   :  { %v309_v10 = vadd.f32 %v308_v1, %v259_v8 }
  0xa9   :  { %v402_v11 = vadd.f32 %v865_v5, %v309_v10 }
  0xaa   :  { %v338_v47 = vpop.f32.mrf.mxu3 }
  0xab   :  { %v418_v13 = vmax.f32 %v402_v11, 0.0 }
  0xac   :  { %v316_v14 = vpop.f32.mrf.mxu1  ;;  %v279_v17 = vpop.f32.mrf.mxu2 }
  0xad   :  { %v619_v16 = vpack.c.bf16 %v418_v13, %v417_v12 }
  0xae   :  { %v262_v18 = vpop.f32.mrf.mxu0 }
  0xaf   :  { %620 = vst [vmem:[#allocation3] sm:$0xff] %v619_v16   ;;  %v312_v19 = vadd.f32 %v311_v2, %v262_v18 }
  0xb1   :  { %v403_v24 = vadd.f32 %v865_v5, %v312_v19 }
  0xb2   :  { %v341_v62 = vpop.f32.mrf.mxu3 }
  0xb3   :  { %v419_v28 = vmax.f32 %v403_v24, 0.0 }
  0xb4   :  { %v318_v20 = vpop.f32.mrf.mxu1  ;;  %v282_v21 = vpop.f32.mrf.mxu2 }
  0xb5   :  { %v332_v27 = vadd.f32 %v331_v15, %v282_v21 }
  0xb6   :  { %v264_v23 = vpop.f32.mrf.mxu0 }
  0xb7   :  { %v314_v25 = vadd.f32 %v313_v6, %v264_v23  ;;  %v411_v33 = vadd.f32 %v865_v5, %v332_v27 }
  0xb9   :  { %v404_v26 = vadd.f32 %v865_v5, %v314_v25  ;;  %v427_v38 = vmax.f32 %v411_v33, 0.0 }
  0xba   :  { %v343_v18 = vpop.f32.mrf.mxu3 }
  0xbb   :  { %v420_v29 = vmax.f32 %v404_v26, 0.0 }
  0xbc   :  { %v321_v30 = vpop.f32.mrf.mxu1  ;;  %v284_v32 = vpop.f32.mrf.mxu2 }
  0xbd   :  { %v624_v31 = vpack.c.bf16 %v420_v29, %v419_v28  ;;  %v334_v34 = vadd.f32 %v333_v22, %v284_v32 }
  0xbe   :  { %v267_v35 = vpop.f32.mrf.mxu0 }
  0xbf   :  { %656 = vst [vmem:[#allocation3 + $0x8] sm:$0xff] %v624_v31   ;;  %v412_v37 = vadd.f32 %v865_v5, %v334_v34  ;;  %v317_v40 = vadd.f32 %v316_v14, %v267_v35 }
  0xc1   :  { %v428_v39 = vmax.f32 %v412_v37, 0.0  ;;  %v405_v45 = vadd.f32 %v865_v5, %v317_v40 }
  0xc3   :  { %v644_v42 = vpack.c.bf16 %v428_v39, %v427_v38  ;;  %v421_v50 = vmax.f32 %v405_v45, 0.0 }
  0xc4   :  { %v323_v41 = vpop.f32.mrf.mxu1  ;;  %v287_v43 = vpop.f32.mrf.mxu2 }
  0xc5   :  { %660 = vst [vmem:[#allocation3 + $0x28] sm:$0xff] %v644_v42   ;;  %v337_v49 = vadd.f32 %v336_v36, %v287_v43 }
  0xc6   :  { %v269_v44 = vpop.f32.mrf.mxu0 }
  0xc7   :  { %v319_v46 = vadd.f32 %v318_v20, %v269_v44  ;;  %v413_v55 = vadd.f32 %v865_v5, %v337_v49 }
  0xc9   :  { %v406_v48 = vadd.f32 %v865_v5, %v319_v46  ;;  %v429_v60 = vmax.f32 %v413_v55, 0.0 }
  0xcb   :  { %v422_v51 = vmax.f32 %v406_v48, 0.0 }
  0xcc   :  { %v326_v52 = vpop.f32.mrf.mxu1  ;;  %v289_v54 = vpop.f32.mrf.mxu2 }
  0xcd   :  { %v629_v53 = vpack.c.bf16 %v422_v51, %v421_v50  ;;  %v339_v56 = vadd.f32 %v338_v47, %v289_v54  ;;  %v327_v58 = vadd.f32 %v326_v52, %v277_v7 }
  0xce   :  { %v272_v57 = vpop.f32.mrf.mxu0 }
  0xcf   :  { %657 = vst [vmem:[#allocation3 + $0x10] sm:$0xff] %v629_v53   ;;  %v414_v59 = vadd.f32 %v865_v5, %v339_v56  ;;  %v322_v63 = vadd.f32 %v321_v30, %v272_v57  ;;  %v409_v1 = vadd.f32 %v865_v5, %v327_v58 }
  0xd1   :  { %v430_v61 = vmax.f32 %v414_v59, 0.0  ;;  %v407_v9 = vadd.f32 %v865_v5, %v322_v63  ;;  %v425_v7 = vmax.f32 %v409_v1, 0.0 }
  0xd3   :  { %v649_v2 = vpack.c.bf16 %v430_v61, %v429_v60  ;;  %v423_v15 = vmax.f32 %v407_v9, 0.0 }
  0xd4   :  { %v328_v0 = vpop.f32.mrf.mxu1  ;;  %v292_v4 = vpop.f32.mrf.mxu2 }
  0xd5   :  { %v329_v3 = vadd.f32 %v328_v0, %v279_v17  ;;  %661 = vst [vmem:[#allocation3 + $0x30] sm:$0xff] %v649_v2   ;;  %v342_v14 = vadd.f32 %v341_v62, %v292_v4 }
  0xd6   :  { %v274_v8 = vpop.f32.mrf.mxu0 }
  0xd7   :  { %v410_v6 = vadd.f32 %v865_v5, %v329_v3  ;;  %v324_v10 = vadd.f32 %v323_v41, %v274_v8  ;;  %v415_v20 = vadd.f32 %v865_v5, %v342_v14 }
  0xd9   :  { %v426_v11 = vmax.f32 %v410_v6, 0.0  ;;  %v408_v12 = vadd.f32 %v865_v5, %v324_v10  ;;  %v431_v23 = vmax.f32 %v415_v20, 0.0 }
  0xdb   :  { %v639_v13 = vpack.c.bf16 %v426_v11, %v425_v7  ;;  %v424_v16 = vmax.f32 %v408_v12, 0.0 }
  0xdc   :  { %v294_v17 = vpop.f32.mrf.mxu2 }
  0xdd   :  { %659 = vst [vmem:[#allocation3 + $0x20] sm:$0xff] %v639_v13   ;;  %v634_v19 = vpack.c.bf16 %v424_v16, %v423_v15  ;;  %v344_v21 = vadd.f32 %v343_v18, %v294_v17 }
  0xdf   :  { %658 = vst [vmem:[#allocation3 + $0x18] sm:$0xff] %v634_v19   ;;  %v416_v22 = vadd.f32 %v865_v5, %v344_v21 }
  0xe1   :  { %v432_v24 = vmax.f32 %v416_v22, 0.0 }
  0xe3   :  { %v654_v25 = vpack.c.bf16 %v432_v24, %v431_v23 }
  0xe5   :  { %662 = vst [vmem:[#allocation3 + $0x38] sm:$0xff] %v654_v25  }
  0xe6   :  { %477 = dma.vmem_to_hbm [thread:$0]  %s470_s2, 1024, %s472_s17, [#allocation4], %s706_s18, %s706_s18, %s707_s19  }
  0xe7   :  { %702 = dma.done.wait [#allocation4], 1024  }
  0xe8   :  { %703 = vsyncadd [#allocation4], 4294966272 }
  0xe9   :  { %482 = vsyncpa [#allocation4], 1 }

</bundles_post_ra>
